<compile_context>
chip_gen: v7x
topology: tpu7x:2x2x1
jax: 0.10.0
libtpu: 0.0.40
codegen_flags: <defaults>
</compile_context>

<pallas_src>
import functools

import jax
import jax.numpy as jnp
from jax import lax
from jax.experimental import pallas as pl
from jax.experimental.pallas import tpu as pltpu

LANE = 128  # TPU lane width


# ----------------------------------------------------------------------------
# Kernel: grid = (batch tiles, HW chunks).  HW is a reduction axis (last).
# ----------------------------------------------------------------------------
def contrastive_kernel(x_ref, wb_ref, bb_ref, w1_ref, b1_ref, w2_ref, b2_ref,
                       out_ref, pool_ref, *, inv_hw):
    hw = pl.program_id(1)

    @pl.when(hw == 0)
    def _():
        pool_ref[...] = jnp.zeros_like(pool_ref)

    # Partial global-average-pool.  x chunk: [TB, C, HW_TILE] f32, HW on lanes;
    # the cross-lane reduce runs on the XLU (which has slack in this mem-bound
    # kernel).  Accumulate the sum in f32 (module pools in f32).
    pool_ref[...] += jnp.sum(x_ref[...], axis=-1)

    @pl.when(hw == pl.num_programs(1) - 1)
    def _():
        pooled = pool_ref[...] * inv_hw                         # [TB, C] f32 mean

        # Backbone projection: Linear(C -> D) + ReLU (bf16 MXU, f32 acc).
        h0 = jnp.dot(pooled.astype(jnp.bfloat16), wb_ref[...],
                     preferred_element_type=jnp.float32)
        h0 = jnp.maximum(h0 + bb_ref[...], 0.0)                 # [TB, Dp]

        # Contrastive head (mlp): Linear(D->D) -> ReLU -> Linear(D->F).
        h1 = jnp.dot(h0.astype(jnp.bfloat16), w1_ref[...],
                     preferred_element_type=jnp.float32)
        h1 = jnp.maximum(h1 + b1_ref[...], 0.0)                 # [TB, Dp]

        f = jnp.dot(h1.astype(jnp.bfloat16), w2_ref[...],
                    preferred_element_type=jnp.float32)
        f = f + b2_ref[...]                                     # [TB, Fp]

        # F.normalize(f, dim=1) == f * rsqrt(max(sum(f^2), eps^2)).
        sq = jnp.sum(f * f, axis=-1, keepdims=True)             # [TB, 1]
        inv = lax.rsqrt(jnp.maximum(sq, 1e-24))                 # EUP slot
        out_ref[...] = (f * inv).astype(out_ref.dtype)


# ----------------------------------------------------------------------------
# Parameter prep (lane padding, bf16 weights) + tiling helpers.
# ----------------------------------------------------------------------------
def _pad_to_multiple(a, axis, mult):
    pad = (-a.shape[axis]) % mult
    if pad == 0:
        return a
    widths = [(0, 0)] * a.ndim
    widths[axis] = (0, pad)
    return jnp.pad(a, widths)


def prepare_params(params):
    """Zero-pad hidden/feature dims to lane multiples (exact) and cast weights
    to bf16 (f32 accumulation happens inside the matmuls).  Biases stay f32."""
    wb, bb, w1, b1, w2, b2 = params
    wb = _pad_to_multiple(wb, 1, LANE).astype(jnp.bfloat16)
    bb = _pad_to_multiple(bb, 1, LANE)
    w1 = _pad_to_multiple(_pad_to_multiple(w1, 0, LANE), 1, LANE).astype(jnp.bfloat16)
    b1 = _pad_to_multiple(b1, 1, LANE)
    w2 = _pad_to_multiple(_pad_to_multiple(w2, 0, LANE), 1, LANE).astype(jnp.bfloat16)
    b2 = _pad_to_multiple(b2, 1, LANE)
    return wb, bb, w1, b1, w2, b2


def _vmem_capacity_bytes():
    try:
        return int(pltpu.get_tpu_info().vmem_capacity_bytes)
    except Exception:
        return 64 << 20  # v7x per-TC physical VMEM -- the smallest of v5e/v6e/v7x


def _choose_hw_tile(HW):
    """Largest multiple-of-128 divisor of HW (capped) so the reduction axis is
    tiled without partial blocks (partial blocks would add garbage to the
    pool accumulator)."""
    if HW % LANE != 0:
        return HW
    cand = (min(HW, 2048) // LANE) * LANE
    while cand >= LANE:
        if HW % cand == 0:
            return cand
        cand -= LANE
    return HW


def _choose_batch_tile(B, per_row_bytes, resident_bytes, vmem_budget):
    """Biggest batch tile that fits the per-TC VMEM budget, capped so the grid
    has >= 2 batch steps when the batch is large enough (v7x dual-TC + DMA
    overlap), rounded to MXU/sublane-friendly multiples."""
    avail = max(vmem_budget - resident_bytes, 8 * per_row_bytes)
    tb = max(8, avail // per_row_bytes)
    tb = min(tb, B)
    if B >= 16:
        tb = min(tb, pl.cdiv(B, 2))
    if tb >= B:
        return B
    for m in (256, 128, 64, 32, 16, 8):   # MXU-native M first, 8 = f32 sublane
        if tb >= m:
            return (tb // m) * m
    return B


# ----------------------------------------------------------------------------
# Wrapper: layout glue, VMEM budgeting, grid/BlockSpec setup.
# ----------------------------------------------------------------------------
def contrastive_forward(x_nchw, params):
    """x_nchw: [B, C, H, W] float32. Returns L2-normalized features [B, features_dim]."""
    B, C, H, W = x_nchw.shape
    HW = H * W
    features_dim = params[4].shape[1]

    wb, bb, w1, b1, w2, b2 = prepare_params(params)
    Dp = wb.shape[1]
    Fp = w2.shape[1]

    # Free, contiguous reshape -- no transpose / cast pass over x in HBM.
    x3 = x_nchw.reshape(B, C, HW)

    # ---- tiling / per-TensorCore VMEM budget ----
    hw_tile = _choose_hw_tile(HW)
    n_hw = HW // hw_tile

    phys_vmem = _vmem_capacity_bytes()
    budget = (phys_vmem * 7) // 10          # ~30% headroom under physical

    # Weights/biases: constant index_map => VMEM resident across the grid.
    # (Default pipelining allocates 2 buffers per operand; count both.)
    resident_bytes = 2 * ((wb.size + w1.size + w2.size) * 2
                          + (bb.size + b1.size + b2.size) * 4)
    x_row_bytes = C * hw_tile * 4           # f32 input chunk, double-buffered
    out_row_bytes = Fp * 4
    pool_row_bytes = max(C, LANE) * 4       # pool scratch (lane-padded)
    per_row = 2 * x_row_bytes + 2 * out_row_bytes + pool_row_bytes

    tb = _choose_batch_tile(B, per_row, resident_bytes, budget)
    n_b = pl.cdiv(B, tb)
    # NOTE: if B % tb != 0 the last tile pools garbage rows; their output writes
    # are dropped by Pallas, so results stay correct.

    needed = resident_bytes + tb * per_row
    vmem_limit = int(min(phys_vmem, max(needed + needed // 4 + (4 << 20), 32 << 20)))

    # Advisory cost: dominated by the streaming read of x (HBM-bound kernel).
    flops = 2 * B * (C * Dp + Dp * Dp + Dp * Fp) + B * C * HW
    bytes_accessed = (x3.size * 4 + B * Fp * 4
                      + (wb.size + w1.size + w2.size) * 2
                      + (bb.size + b1.size + b2.size) * 4)
    cost = pl.CostEstimate(flops=flops, transcendentals=B,
                           bytes_accessed=bytes_accessed)

    kernel = functools.partial(contrastive_kernel, inv_hw=1.0 / HW)

    def resident(shape):
        # Full-array block, constant index_map -> stays in VMEM across the grid.
        return pl.BlockSpec(shape, lambda i, j: (0,) * len(shape))

    out = pl.pallas_call(
        kernel,
        out_shape=jax.ShapeDtypeStruct((B, Fp), jnp.float32),
        grid_spec=pltpu.PrefetchScalarGridSpec(
            num_scalar_prefetch=0,
            grid=(n_b, n_hw),                                    # reduction axis last
            in_specs=[
                pl.BlockSpec((tb, C, hw_tile), lambda i, j: (i, 0, j)),  # x tile
                resident((C, Dp)),                               # wb
                resident((1, Dp)),                               # bb
                resident((Dp, Dp)),                              # w1
                resident((1, Dp)),                               # b1
                resident((Dp, Fp)),                              # w2
                resident((1, Fp)),                               # b2
            ],
            out_specs=pl.BlockSpec((tb, Fp), lambda i, j: (i, 0)),
            scratch_shapes=[pltpu.VMEM((tb, C), jnp.float32)],   # pool accumulator
        ),
        compiler_params=pltpu.CompilerParams(
            dimension_semantics=("parallel", "arbitrary"),
            vmem_limit_bytes=vmem_limit),
        cost_estimate=cost,
    )(x3, wb, bb, w1, b1, w2, b2)

    return out[:, :features_dim]


# ----------------------------------------------------------------------------
# Parameter init + references.
# ----------------------------------------------------------------------------
def init_params(key, in_channels, backbone_dim, features_dim):
    """Deterministic synthetic weights (shapes follow the module's __init__)."""
    ks = jax.random.split(key, 6)

    def lin(kw, kb, fan_in, fan_out):
        bound = 1.0 / (fan_in ** 0.5)
        w = jax.random.uniform(kw, (fan_in, fan_out), jnp.float32, -bound, bound)
        b = jax.random.uniform(kb, (1, fan_out), jnp.float32, -bound, bound)
        return w, b

    wb, bb = lin(ks[0], ks[1], in_channels, backbone_dim)       # backbone linear
    w1, b1 = lin(ks[2], ks[3], backbone_dim, backbone_dim)      # head layer 1
    w2, b2 = lin(ks[4], ks[5], backbone_dim, features_dim)      # head layer 2
    return wb, bb, w1, b1, w2, b2


def reference_forward_f32(x_nchw, params):
    """Pure-f32 reference (module semantics)."""
    wb, bb, w1, b1, w2, b2 = params
    B, C, H, W = x_nchw.shape
    pooled = jnp.mean(x_nchw.reshape(B, C, H * W), axis=-1)
    h0 = jnp.maximum(pooled @ wb + bb, 0.0)
    h1 = jnp.maximum(h0 @ w1 + b1, 0.0)
    f = h1 @ w2 + b2
    norm = jnp.maximum(jnp.linalg.norm(f, axis=1, keepdims=True), 1e-12)
    return f / norm


def reference_forward_matched(x_nchw, params):
    """Pure-JAX reference with the same f32 pooling + bf16 matmul casts as the kernel."""
    B, C, H, W = x_nchw.shape
    features_dim = params[4].shape[1]
    wb, bb, w1, b1, w2, b2 = prepare_params(params)
    pooled = jnp.mean(x_nchw.reshape(B, C, H * W), axis=-1)     # f32 pool
    h0 = jnp.maximum(jnp.dot(pooled.astype(jnp.bfloat16), wb,
                             preferred_element_type=jnp.float32) + bb, 0.0)
    h1 = jnp.maximum(jnp.dot(h0.astype(jnp.bfloat16), w1,
                             preferred_element_type=jnp.float32) + b1, 0.0)
    f = jnp.dot(h1.astype(jnp.bfloat16), w2,
                preferred_element_type=jnp.float32) + b2
    norm = jnp.maximum(jnp.linalg.norm(f, axis=1, keepdims=True), 1e-12)
    return (f / norm)[:, :features_dim]


if __name__ == "__main__":
    B, C, H, W = 2, 4, 16, 16
    backbone_dim, features_dim = 32, 128

    key = jax.random.PRNGKey(0)
    kx, kp = jax.random.split(key)
    x = jax.random.normal(kx, (B, C, H, W), dtype=jnp.float32)
    params = init_params(kp, C, backbone_dim, features_dim)

    out = jax.block_until_ready(contrastive_forward(x, params))

    ref_matched = reference_forward_matched(x, params)   # same casts as kernel
    ref_f32 = reference_forward_f32(x, params)           # module semantics

    assert out.shape == (B, features_dim), out.shape
    assert jnp.allclose(out, ref_matched, atol=1e-3, rtol=1e-3), \
        "mismatch vs bf16-matched reference"
    assert jnp.allclose(out, ref_f32, atol=3e-2, rtol=3e-2), \
        "mismatch vs f32 reference beyond bf16 tolerance"
    # rows are unit-norm
    assert jnp.allclose(jnp.linalg.norm(out, axis=1), 1.0, atol=1e-4)

    print("KERNEL_OK")
</pallas_src>

<mosaic_0001>
module attributes {stable_mosaic.version = 11 : i64} {
  func.func @contrastive_kernel(%arg0: i32, %arg1: i32, %arg2: memref<2x4x256xf32, #tpu.memory_space<vmem>>, %arg3: memref<4x128xbf16, #tpu.memory_space<vmem>>, %arg4: memref<1x128xf32, #tpu.memory_space<vmem>>, %arg5: memref<128x128xbf16, #tpu.memory_space<vmem>>, %arg6: memref<1x128xf32, #tpu.memory_space<vmem>>, %arg7: memref<128x128xbf16, #tpu.memory_space<vmem>>, %arg8: memref<1x128xf32, #tpu.memory_space<vmem>>, %arg9: memref<2x128xf32, #tpu.memory_space<vmem>>, %arg10: memref<2x4xf32, #tpu.memory_space<vmem>>) attributes {dimension_semantics = [#tpu.dimension_semantics<parallel>, #tpu.dimension_semantics<arbitrary>], iteration_bounds = array<i64: 1, 1>, scalar_prefetch = 0 : i64, scratch_operands = 1 : i64, tpu.core_type = #tpu.core_type<tc>, window_params = [{transform_indices = @transform_0, window_bounds = array<i64: 2, 4, 256>}, {pipeline_mode = #tpu.pipeline_mode<synchronous>, transform_indices = @transform_1, window_bounds = array<i64: 4, 128>}, {pipeline_mode = #tpu.pipeline_mode<synchronous>, transform_indices = @transform_2, window_bounds = array<i64: 1, 128>}, {pipeline_mode = #tpu.pipeline_mode<synchronous>, transform_indices = @transform_3, window_bounds = array<i64: 128, 128>}, {pipeline_mode = #tpu.pipeline_mode<synchronous>, transform_indices = @transform_4, window_bounds = array<i64: 1, 128>}, {pipeline_mode = #tpu.pipeline_mode<synchronous>, transform_indices = @transform_5, window_bounds = array<i64: 128, 128>}, {pipeline_mode = #tpu.pipeline_mode<synchronous>, transform_indices = @transform_6, window_bounds = array<i64: 1, 128>}, {transform_indices = @transform_7, window_bounds = array<i64: 2, 128>}]} {
    %c0_i32 = arith.constant 0 : i32
    %0 = arith.cmpi eq, %arg1, %c0_i32 : i32
    %1 = arith.extui %0 : i1 to i32
    %c0_i32_0 = arith.constant 0 : i32
    %2 = arith.cmpi ne, %1, %c0_i32_0 : i32
    scf.if %2 {
      %cst_9 = arith.constant 0.000000e+00 : f32
      %11 = vector.broadcast %cst_9 : f32 to vector<2x4xf32>
      %c0_10 = arith.constant 0 : index
      %c0_11 = arith.constant 0 : index
      %12 = vector.load %arg10[%c0_10, %c0_11] : memref<2x4xf32, #tpu.memory_space<vmem>>, vector<2x4xf32>
      tpu.vector_store %arg10[%c0_10, %c0_11], %11 {strides = array<i32>} : memref<2x4xf32, #tpu.memory_space<vmem>>, vector<2x4xf32>,
    } else {
    }
    %c0 = arith.constant 0 : index
    %c0_1 = arith.constant 0 : index
    %3 = vector.load %arg10[%c0, %c0_1] : memref<2x4xf32, #tpu.memory_space<vmem>>, vector<2x4xf32>
    %c0_2 = arith.constant 0 : index
    %c0_3 = arith.constant 0 : index
    %c0_4 = arith.constant 0 : index
    %4 = vector.load %arg2[%c0_2, %c0_3, %c0_4] : memref<2x4x256xf32, #tpu.memory_space<vmem>>, vector<2x4x256xf32>
    %cst = arith.constant dense<0.000000e+00> : vector<2x4xf32>
    %5 = vector.multi_reduction <add>, %4, %cst [2] : vector<2x4x256xf32> to vector<2x4xf32>
    %6 = arith.addf %3, %5 : vector<2x4xf32>
    %c0_5 = arith.constant 0 : index
    %c0_6 = arith.constant 0 : index
    %7 = vector.load %arg10[%c0_5, %c0_6] : memref<2x4xf32, #tpu.memory_space<vmem>>, vector<2x4xf32>
    tpu.vector_store %arg10[%c0_5, %c0_6], %6 {strides = array<i32>} : memref<2x4xf32, #tpu.memory_space<vmem>>, vector<2x4xf32>,
    %c0_i32_7 = arith.constant 0 : i32
    %8 = arith.cmpi eq, %arg1, %c0_i32_7 : i32
    %9 = arith.extui %8 : i1 to i32
    %c0_i32_8 = arith.constant 0 : i32
    %10 = arith.cmpi ne, %9, %c0_i32_8 : i32
    scf.if %10 {
      %c0_9 = arith.constant 0 : index
      %c0_10 = arith.constant 0 : index
      %11 = vector.load %arg10[%c0_9, %c0_10] : memref<2x4xf32, #tpu.memory_space<vmem>>, vector<2x4xf32>
      %cst_11 = arith.constant 3.906250e-03 : f32
      %12 = vector.broadcast %cst_11 : f32 to vector<2x4xf32>
      %13 = arith.mulf %11, %12 : vector<2x4xf32>
      %14 = arith.truncf %13 : vector<2x4xf32> to vector<2x4xbf16>
      %c0_12 = arith.constant 0 : index
      %c0_13 = arith.constant 0 : index
      %15 = vector.load %arg3[%c0_12, %c0_13] : memref<4x128xbf16, #tpu.memory_space<vmem>>, vector<4x128xbf16>
      %cst_14 = arith.constant dense<0.000000e+00> : vector<2x128xf32>
      %16 = tpu.matmul %14, %15, %cst_14 {dimension_numbers = #tpu.dot_dimension_numbers<[1], [0], [0], [1], [0, 0, 1, 1], [], []>} : vector<2x4xbf16>, vector<4x128xbf16>, vector<2x128xf32> -> vector<2x128xf32>
      %c0_15 = arith.constant 0 : index
      %c0_16 = arith.constant 0 : index
      %17 = vector.load %arg4[%c0_15, %c0_16] : memref<1x128xf32, #tpu.memory_space<vmem>>, vector<1x128xf32>
      %18 = vector.broadcast %17 : vector<1x128xf32> to vector<2x128xf32>
      %19 = arith.addf %16, %18 : vector<2x128xf32>
      %cst_17 = arith.constant 0.000000e+00 : f32
      %20 = vector.broadcast %cst_17 : f32 to vector<2x128xf32>
      %21 = arith.maximumf %19, %20 : vector<2x128xf32>
      %22 = arith.truncf %21 : vector<2x128xf32> to vector<2x128xbf16>
      %c0_18 = arith.constant 0 : index
      %c0_19 = arith.constant 0 : index
      %23 = vector.load %arg5[%c0_18, %c0_19] : memref<128x128xbf16, #tpu.memory_space<vmem>>, vector<128x128xbf16>
      %cst_20 = arith.constant dense<0.000000e+00> : vector<2x128xf32>
      %24 = tpu.matmul %22, %23, %cst_20 {dimension_numbers = #tpu.dot_dimension_numbers<[1], [0], [0], [1], [0, 0, 1, 1], [], []>} : vector<2x128xbf16>, vector<128x128xbf16>, vector<2x128xf32> -> vector<2x128xf32>
      %c0_21 = arith.constant 0 : index
      %c0_22 = arith.constant 0 : index
      %25 = vector.load %arg6[%c0_21, %c0_22] : memref<1x128xf32, #tpu.memory_space<vmem>>, vector<1x128xf32>
      %26 = vector.broadcast %25 : vector<1x128xf32> to vector<2x128xf32>
      %27 = arith.addf %24, %26 : vector<2x128xf32>
      %cst_23 = arith.constant 0.000000e+00 : f32
      %28 = vector.broadcast %cst_23 : f32 to vector<2x128xf32>
      %29 = arith.maximumf %27, %28 : vector<2x128xf32>
      %30 = arith.truncf %29 : vector<2x128xf32> to vector<2x128xbf16>
      %c0_24 = arith.constant 0 : index
      %c0_25 = arith.constant 0 : index
      %31 = vector.load %arg7[%c0_24, %c0_25] : memref<128x128xbf16, #tpu.memory_space<vmem>>, vector<128x128xbf16>
      %cst_26 = arith.constant dense<0.000000e+00> : vector<2x128xf32>
      %32 = tpu.matmul %30, %31, %cst_26 {dimension_numbers = #tpu.dot_dimension_numbers<[1], [0], [0], [1], [0, 0, 1, 1], [], []>} : vector<2x128xbf16>, vector<128x128xbf16>, vector<2x128xf32> -> vector<2x128xf32>
      %c0_27 = arith.constant 0 : index
      %c0_28 = arith.constant 0 : index
      %33 = vector.load %arg8[%c0_27, %c0_28] : memref<1x128xf32, #tpu.memory_space<vmem>>, vector<1x128xf32>
      %34 = vector.broadcast %33 : vector<1x128xf32> to vector<2x128xf32>
      %35 = arith.addf %32, %34 : vector<2x128xf32>
      %36 = arith.mulf %35, %35 : vector<2x128xf32>
      %cst_29 = arith.constant dense<0.000000e+00> : vector<2xf32>
      %37 = vector.multi_reduction <add>, %36, %cst_29 [1] : vector<2x128xf32> to vector<2xf32>
      %38 = vector.shape_cast %37 : vector<2xf32> to vector<2x1xf32>
      %cst_30 = arith.constant 1.000000e-24 : f32
      %39 = vector.broadcast %cst_30 : f32 to vector<2x1xf32>
      %40 = arith.maximumf %38, %39 : vector<2x1xf32>
      %41 = math.rsqrt %40 : vector<2x1xf32>
      %42 = vector.broadcast %41 : vector<2x1xf32> to vector<2x128xf32>
      %43 = arith.mulf %35, %42 : vector<2x128xf32>
      %c0_31 = arith.constant 0 : index
      %c0_32 = arith.constant 0 : index
      %44 = vector.load %arg9[%c0_31, %c0_32] : memref<2x128xf32, #tpu.memory_space<vmem>>, vector<2x128xf32>
      tpu.vector_store %arg9[%c0_31, %c0_32], %43 {strides = array<i32>} : memref<2x128xf32, #tpu.memory_space<vmem>>, vector<2x128xf32>,
    } else {
    }
    return
  }
  func.func @transform_0(%arg0: i32, %arg1: i32) -> (i32, i32, i32) {
    %c0_i32 = arith.constant 0 : i32
    %c0_i32_0 = arith.constant 0 : i32
    return %arg0, %c0_i32, %arg1 : i32, i32, i32
  }
  func.func @transform_1(%arg0: i32, %arg1: i32) -> (i32, i32) {
    %c0_i32 = arith.constant 0 : i32
    %c0_i32_0 = arith.constant 0 : i32
    %c0_i32_1 = arith.constant 0 : i32
    return %c0_i32, %c0_i32_0 : i32, i32
  }
  func.func @transform_2(%arg0: i32, %arg1: i32) -> (i32, i32) {
    %c0_i32 = arith.constant 0 : i32
    %c0_i32_0 = arith.constant 0 : i32
    %c0_i32_1 = arith.constant 0 : i32
    return %c0_i32, %c0_i32_0 : i32, i32
  }
  func.func @transform_3(%arg0: i32, %arg1: i32) -> (i32, i32) {
    %c0_i32 = arith.constant 0 : i32
    %c0_i32_0 = arith.constant 0 : i32
    %c0_i32_1 = arith.constant 0 : i32
    return %c0_i32, %c0_i32_0 : i32, i32
  }
  func.func @transform_4(%arg0: i32, %arg1: i32) -> (i32, i32) {
    %c0_i32 = arith.constant 0 : i32
    %c0_i32_0 = arith.constant 0 : i32
    %c0_i32_1 = arith.constant 0 : i32
    return %c0_i32, %c0_i32_0 : i32, i32
  }
  func.func @transform_5(%arg0: i32, %arg1: i32) -> (i32, i32) {
    %c0_i32 = arith.constant 0 : i32
    %c0_i32_0 = arith.constant 0 : i32
    %c0_i32_1 = arith.constant 0 : i32
    return %c0_i32, %c0_i32_0 : i32, i32
  }
  func.func @transform_6(%arg0: i32, %arg1: i32) -> (i32, i32) {
    %c0_i32 = arith.constant 0 : i32
    %c0_i32_0 = arith.constant 0 : i32
    %c0_i32_1 = arith.constant 0 : i32
    return %c0_i32, %c0_i32_0 : i32, i32
  }
  func.func @transform_7(%arg0: i32, %arg1: i32) -> (i32, i32) {
    %c0_i32 = arith.constant 0 : i32
    %c0_i32_0 = arith.constant 0 : i32
    return %arg0, %c0_i32 : i32, i32
  }
}

</mosaic_0001>

<bundles_post_ra>
// kernel: tpu_custom_call.1
= control target key start
LH: loop header
LB: loop body
LE: loop exit
PB: predicated region body
PF: predicated region fallthrough
CT: control target
= control target key end

     0   :  { %12 = vsyncpa [#allocation4], 0  ;;  %s779_s0 = inlined_call_operand.hbm [shape: f32[2,4,256], index: 0, kind: input, shape index: {}]   ;;  %s780_s1 = inlined_call_operand.vmem [shape: bf16[4,128], index: 1, kind: input, shape index: {}]   ;;  %s781_s2 = inlined_call_operand.vmem [shape: f32[1,128], index: 2, kind: input, shape index: {}]   ;;  %s782_s3 = inlined_call_operand.hbm [shape: bf16[128,128], index: 3, kind: input, shape index: {}]   ;;  %s783_s4 = inlined_call_operand.vmem [shape: f32[1,128], index: 4, kind: input, shape index: {}]   ;;  %s784_s5 = inlined_call_operand.hbm [shape: bf16[128,128], index: 5, kind: input, shape index: {}]   ;;  %s785_s6 = inlined_call_operand.vmem [shape: f32[1,128], index: 6, kind: input, shape index: {}]   ;;  %s786_s7 = inlined_call_operand.hbm [shape: f32[2,128], index: 7, kind: output, shape index: {}]  }
   0x1   :  { %13 = vsyncpa [#allocation7], 0 }
   0x2   :  { %14 = vsyncpa [#allocation5], 0  ;;  %s635_s24 = smov [#allocation6]   ;;  %s541_s28 = scalar_lea.hbm %s782_s3, 1024 }
   0x3   :  { %s36_s25 = sshll.u32 %s635_s24, 4  ;;  %p542_p0 = scmp.ne.s32.totalorder %s782_s3, %s541_s28  ;;  %s37_s25 = int_to_ptr.vmem [resolvable:$true] %s36_s25 }
   0x4   :  { %p545_p1 = scmp.lt.u32.totalorder %s541_s28, %s782_s3 }
   0x6   :  { %p547_p2 = pnand %p545_p1, %p542_p0 }
   0x8   :  { %550 = shalt.err (!%p547_p2)
}
   0x9   :  { %s551_s10 = scalar_lea.vmem %s37_s25, 1024  ;;  %p556_p4 = scmp.lt.s32.totalorder %s37_s25, %s37_s25 }
   0xa   :  { %p552_p3 = scmp.ne.s32.totalorder %s37_s25, %s551_s10  ;;  %p557_p5 = scmp.lt.s32.totalorder %s551_s10, %s551_s10 }
   0xc   :  { %p558_p6 = por %p557_p5, %p556_p4 }
   0xe   :  { %p559_p7 = pnand %p558_p6, %p552_p3 }
  0x10   :  { %562 = shalt.err (!%p559_p7)
}
  0x11   :  { %s636_s11 = smov 64   ;;  %s637_s12 = smov 4  }
  0x12   :  { %42 = dma.hbm_to_vmem [thread:$0]  %s782_s3, 1024, %s37_s25, [#allocation7], %s636_s11, %s636_s11, %s637_s12  }
  0x13   :  { %s638_s15 = smov [#allocation3]   ;;  %s563_s19 = scalar_lea.hbm %s779_s0, 256 }
  0x14   :  { %s20_s16 = sshll.u32 %s638_s15, 4  ;;  %p564_p8 = scmp.ne.s32.totalorder %s779_s0, %s563_s19  ;;  %s21_s16 = int_to_ptr.vmem [resolvable:$true] %s20_s16 }
  0x15   :  { %p567_p9 = scmp.lt.u32.totalorder %s563_s19, %s779_s0 }
  0x17   :  { %p569_p10 = pnand %p567_p9, %p564_p8 }
  0x19   :  { %572 = shalt.err (!%p569_p10)
}
  0x1a   :  { %s573_s24 = scalar_lea.vmem %s21_s16, 256  ;;  %p578_p12 = scmp.lt.s32.totalorder %s21_s16, %s21_s16 }
  0x1b   :  { %p574_p11 = scmp.ne.s32.totalorder %s21_s16, %s573_s24  ;;  %p579_p13 = scmp.lt.s32.totalorder %s573_s24, %s573_s24 }
  0x1d   :  { %p580_p0 = por %p579_p13, %p578_p12 }
  0x1f   :  { %p581_p1 = pnand %p580_p0, %p574_p11 }
  0x21   :  { %584 = shalt.err (!%p581_p1)
}
  0x22   :  { %s639_s3 = smov 128   ;;  %s640_s25 = smov 8  }
  0x23   :  { %26 = dma.hbm_to_vmem [thread:$0]  %s779_s0, 256, %s21_s16, [#allocation4], %s639_s3, %s639_s3, %s640_s25  }
  0x24   :  { %s641_s28 = smov [#allocation8]   ;;  %s585_s9 = scalar_lea.hbm %s784_s5, 1024 }
  0x25   :  { %s50_s29 = sshll.u32 %s641_s28, 4  ;;  %p586_p2 = scmp.ne.s32.totalorder %s784_s5, %s585_s9  ;;  %s51_s29 = int_to_ptr.vmem [resolvable:$true] %s50_s29 }
  0x26   :  { %p589_p3 = scmp.lt.u32.totalorder %s585_s9, %s784_s5 }
  0x28   :  { %p591_p4 = pnand %p589_p3, %p586_p2 }
  0x2a   :  { %594 = shalt.err (!%p591_p4)
}
  0x2b   :  { %s595_s17 = scalar_lea.vmem %s51_s29, 1024  ;;  %p600_p6 = scmp.lt.s32.totalorder %s51_s29, %s51_s29 }
  0x2c   :  { %p596_p5 = scmp.ne.s32.totalorder %s51_s29, %s595_s17  ;;  %p601_p7 = scmp.lt.s32.totalorder %s595_s17, %s595_s17 }
  0x2e   :  { %p602_p8 = por %p601_p7, %p600_p6 }
  0x30   :  { %p603_p9 = pnand %p602_p8, %p596_p5 }
  0x32   :  { %606 = shalt.err (!%p603_p9)
}
  0x33   :  { %56 = dma.hbm_to_vmem [thread:$0]  %s784_s5, 1024, %s51_s29, [#allocation7], %s636_s11, %s636_s11, %s637_s12  }
  0x34   :  { %629 = dma.done.wait [#allocation4], 256  }
  0x35   :  { %630 = vsyncadd [#allocation4], 4294967040 }
  0x36   :  { %631 = dma.done.wait [#allocation7], 2048  }
  0x37   :  { %632 = vsyncadd [#allocation7], 4294965248  ;;  %vm84_vm0 = vcmask 1043456   ;;  %v76_v0 = vld [vmem:[#allocation3] sm:$0xff]  ;;  %v77_v1 = vld [vmem:[#allocation3 + $0x8] sm:$0xff]  ;;  %vm73_vm1 = vcmask 25600   ;;  %v97_v19 = vlaneseq }
  0x38   :  { %v80_v2 = vcombine.high %v76_v0, %v76_v0  ;;  %v85_v3 = vsel %vm84_vm0, %v76_v0, 0.0  ;;  %v81_v4 = vcombine.high %v77_v1, %v77_v1  ;;  %v90_v5 = vsel %vm84_vm0, %v77_v1, 0.0  ;;  %v119_v11 = vld [vmem:[%s780_s1] sm:$0x3]  ;;  %v523_v13 = vld [vmem:[#allocation6] sm:$0xff]   ;;  %v525_v15 = vld [vmem:[#allocation6 + $0x10] sm:$0xff]  }
  0x39   :  { %v642_v10 = vmov 0.0   ;;  %vm131_vm2 = vcmask 1041408   ;;  %vm643_vm3 = vmmov 0   ;;  %v524_v14 = vld [vmem:[#allocation6 + $0x8] sm:$0xff]   ;;  %v526_v16 = vld [vmem:[#allocation6 + $0x18] sm:$0xff]   ;;  %v527_v17 = vld [vmem:[#allocation6 + $0x20] sm:$0xff]  }
  0x3a   :  { %v86_v6 = vsel %vm84_vm0, %v80_v2, 0.0  ;;  %v91_v7 = vsel %vm84_vm0, %v81_v4, 0.0  ;;  %74 = vst.msk [vmem:[#allocation2] sm:$0x3] %vm73_vm1, %v642_v10  ;;  %465 = vmatprep.subr.bf16.mxu0 %v642_v10  ;;  %471 = vmatprep.subr.bf16.mxu1 %v642_v10  ;;  %v133_v12 = vsel %vm131_vm2, %v119_v11, 0  ;;  %v528_v18 = vld [vmem:[#allocation6 + $0x28] sm:$0xff]  }
  0x3b   :  { %v87_v8 = vadd.f32 %v86_v6, %v85_v3  ;;  %v92_v9 = vadd.f32 %v91_v7, %v90_v5  ;;  %467 = vmatprep.mubr.msk.bf16.mxu0 %vm643_vm3, %v642_v10  ;;  %487 = vmatprep.mubr.msk.bf16.mxu1 %vm643_vm3, %v642_v10  ;;  %v98_v20 = vand.u32 127, %v97_v19  ;;  %v100_v21 = vshrl.u32 %v97_v19, 7  ;;  %v529_v33 = vld [vmem:[#allocation6 + $0x30] sm:$0xff]   ;;  %v530_v34 = vld [vmem:[#allocation6 + $0x38] sm:$0xff]   ;;  %v531_v35 = vld [vmem:[#allocation8] sm:$0xff]  }
  0x3c   :  { %466 = vmatpush3.bf16.msra.mxu0 %v133_v12  ;;  %472 = vmatpush3.bf16.msra.mxu1 %v523_v13  ;;  %vm107_vm4 = vcmask 1041409   ;;  %vm127_vm5 = vcmask 31744   ;;  %v532_v36 = vld [vmem:[#allocation8 + $0x8] sm:$0xff]   ;;  %v533_v37 = vld [vmem:[#allocation8 + $0x10] sm:$0xff]   ;;  %v534_v38 = vld [vmem:[#allocation8 + $0x18] sm:$0xff]  }
  0x3d   :  { %88 = vadd.xlane.f32.xlu0 %v87_v8  ;;  %491 = vmatprep.subr.bf16.mxu0 %v642_v10  ;;  %v101_v23 = vsub.s32 %v98_v20, %v100_v21  ;;  %v535_v39 = vld [vmem:[#allocation8 + $0x20] sm:$0xff]   ;;  %v536_v40 = vld [vmem:[#allocation8 + $0x28] sm:$0xff]   ;;  %v537_v49 = vld [vmem:[#allocation8 + $0x30] sm:$0xff]  }
  0x3e   :  { %473 = vmatprep.subr.bf16.mxu1 %v642_v10  ;;  %v425_v41 = vld [vmem:[%s781_s2] ss:$0 sm:$0xff]  ;;  %v538_v50 = vld [vmem:[#allocation8 + $0x38] sm:$0xff]  }
  0x3f   :  { %v427_v51 = vld [vmem:[%s783_s4] ss:$0 sm:$0xff]  ;;  %s644_s4 = smov [#allocation9]  }
  0x40   :  { %474 = vmatpush3.bf16.msra.mxu1 %v524_v14  ;;  %v436_v59 = vld [vmem:[%s785_s6] ss:$0 sm:$0xff]  ;;  %s415_s21 = sshll.u32 %s644_s4, 4  ;;  %s416_s21 = int_to_ptr.vmem [resolvable:$true] %s415_s21 }
  0x41   :  { %93 = vadd.xlane.f32.xlu0 %v92_v9  ;;  %475 = vmatprep.subr.bf16.mxu1 %v642_v10  ;;  %v75_v26 = vld [vmem:[#allocation2] sm:$0x3]  ;;  %s607_s22 = scalar_lea.vmem %s416_s21, 32  ;;  %p612_p11 = scmp.lt.s32.totalorder %s416_s21, %s416_s21 }
  0x42   :  { %p608_p10 = scmp.ne.s32.totalorder %s416_s21, %s607_s22  ;;  %p613_p12 = scmp.lt.s32.totalorder %s607_s22, %s607_s22 }
  0x44   :  { %476 = vmatpush3.bf16.msra.mxu1 %v525_v15  ;;  %p614_p13 = por %p613_p12, %p612_p11 }
  0x45   :  { %477 = vmatprep.subr.bf16.mxu1 %v642_v10 }
  0x46   :  { %p615_p0 = pnand %p614_p13, %p608_p10 }
  0x48   :  { %478 = vmatpush3.bf16.msra.mxu1 %v526_v16 }
  0x49   :  { %479 = vmatprep.subr.bf16.mxu1 %v642_v10 }
  0x4c   :  { %480 = vmatpush3.bf16.msra.mxu1 %v527_v17 }
  0x4d   :  { %481 = vmatprep.subr.bf16.mxu1 %v642_v10 }
  0x50   :  { %482 = vmatpush3.bf16.msra.mxu1 %v528_v18 }
  0x51   :  { %483 = vmatprep.subr.bf16.mxu1 %v642_v10 }
  0x54   :  { %484 = vmatpush3.bf16.msra.mxu1 %v529_v33 }
  0x55   :  { %485 = vmatprep.subr.bf16.mxu1 %v642_v10 }
  0x58   :  { %486 = vmatpush3.bf16.msra.mxu1 %v530_v34 }
  0xca   :  { %v89_v22 = vpop.xlane.xlu0 %88 }
  0xcb   :  { %v102_v25 = vrot.slane %v89_v22, %v101_v23 }
  0xce   :  { %v94_v24 = vpop.xlane.xlu0 %93 }
  0xcf   :  { %v106_v27 = vrot.slane %v94_v24, %v101_v23 }
  0xd1   :  { %v108_v28 = vsel %vm107_vm4, %v106_v27, %v102_v25 }
  0xd2   :  { %v110_v29 = vadd.f32 %v108_v28, %v75_v26 }
  0xd4   :  { %112 = vst.msk [vmem:[#allocation2] sm:$0x3] %vm73_vm1, %v110_v29 }
  0xdb   :  { %v116_v30 = vld [vmem:[#allocation2] sm:$0x3] }
  0xdc   :  { %v117_v31 = vmul.f32 0.00390625, %v116_v30 }
  0xde   :  { %v118_v32 = vpack.c.bf16 %v117_v31, %v117_v31 }
  0xe0   :  { %468 = vmatmul.mubr.msk.bf16.vlgmr.msra.gmra.mrb[0].mxu0 %vm127_vm5, %v118_v32 }
  0xe1   :  { %507 = vmatprep.mubr.msk.bf16.mxu0 %vm643_vm3, %v642_v10  ;;  %492 = vmatpush3.bf16.msra.mxu0 %v531_v35 }
  0xe2   :  { %493 = vmatprep.subr.bf16.mxu0 %v642_v10 }
  0xe5   :  { %494 = vmatpush3.bf16.msra.mxu0 %v532_v36 }
  0xe6   :  { %495 = vmatprep.subr.bf16.mxu0 %v642_v10 }
  0xe9   :  { %496 = vmatpush3.bf16.msra.mxu0 %v533_v37 }
  0xea   :  { %497 = vmatprep.subr.bf16.mxu0 %v642_v10 }
  0xed   :  { %498 = vmatpush3.bf16.msra.mxu0 %v534_v38 }
  0xee   :  { %499 = vmatprep.subr.bf16.mxu0 %v642_v10 }
  0xf1   :  { %500 = vmatpush3.bf16.msra.mxu0 %v535_v39 }
  0xf2   :  { %501 = vmatprep.subr.bf16.mxu0 %v642_v10 }
  0xf5   :  { %502 = vmatpush3.bf16.msra.mxu0 %v536_v40 }
  0xf6   :  { %503 = vmatprep.subr.bf16.mxu0 %v642_v10 }
  0xf9   :  { %504 = vmatpush3.bf16.msra.mxu0 %v537_v49 }
  0xfa   :  { %505 = vmatprep.subr.bf16.mxu0 %v642_v10 }
  0xfd   :  { %506 = vmatpush3.bf16.msra.mxu0 %v538_v50 }
 0x1b3   :  { %v169_v42 = vpop.f32.mrb[0].mxu0 }
 0x1b4   :  { %v170_v43 = vadd.f32 %v425_v41, %v169_v42  ;;  %v469_v44 = vpop.f32.mrb[1].mxu0 }
 0x1b5   :  { %v172_v45 = vpop.f32.mrb[2].mxu0 }
 0x1b6   :  { %v175_v46 = vmax.f32 %v170_v43, 0.0  ;;  %v470_v47 = vpop.f32.mrb[3].mxu0 }
 0x1b8   :  { %v176_v48 = vpack.c.bf16 %v175_v46, %v175_v46 }
 0x1ba   :  { %488 = vmatmul.mubr.bf16.vlgmr.msra.gmra.mrb[0].mxu1 %v176_v48 }
 0x28d   :  { %v282_v52 = vpop.f32.mrb[0].mxu1 }
 0x28e   :  { %v283_v53 = vadd.f32 %v427_v51, %v282_v52  ;;  %v489_v54 = vpop.f32.mrb[1].mxu1 }
 0x28f   :  { %v285_v55 = vpop.f32.mrb[2].mxu1 }
 0x290   :  { %v288_v56 = vmax.f32 %v283_v53, 0.0  ;;  %v490_v57 = vpop.f32.mrb[3].mxu1 }
 0x292   :  { %v289_v58 = vpack.c.bf16 %v288_v56, %v288_v56 }
 0x294   :  { %508 = vmatmul.mubr.bf16.vlgmr.msra.gmra.mrb[4].mxu0 %v289_v58 }
 0x367   :  { %v395_v60 = vpop.f32.mrb[4].mxu0 }
 0x368   :  { %v396_v61 = vadd.f32 %v436_v59, %v395_v60  ;;  %v509_v62 = vpop.f32.mrb[5].mxu0 }
 0x369   :  { %v398_v63 = vpop.f32.mrb[6].mxu0 }
 0x36a   :  { %v510_v0 = vpop.f32.mrb[7].mxu0  ;;  %v401_v1 = vmul.f32 %v396_v61, %v396_v61 }
 0x36c   :  { %v402_v2 = vsel %vm131_vm2, %v401_v1, 0.0 }
 0x36d   :  { %403 = vadd.xlane.f32.xlu1 %v402_v2 }
 0x3fa   :  { %v404_v3 = vpop.xlane.xlu1 %403 }
 0x3fb   :  { %v405_v4 = vmax.f32 %v404_v3, 1e-24 }
 0x3fd   :  { %539 = vrsqrt.f32 %v405_v4 }
 0x407   :  { %v540_v5 = vpop.eup %539 }
 0x408   :  { %v407_v6 = vmul.f32 %v540_v5, %v396_v61 }
 0x40a   :  { %408 = vst [vmem:[#allocation9] sm:$0x3] %v407_v6 }
 0x40b   :  { %618 = shalt.err (!%p615_p0)
}
 0x40c   :  { %s619_s24 = scalar_lea.hbm %s786_s7, 32 }
 0x40d   :  { %p620_p1 = scmp.ne.s32.totalorder %s786_s7, %s619_s24  ;;  %p623_p2 = scmp.lt.u32.totalorder %s619_s24, %s786_s7 }
 0x40f   :  { %p625_p3 = pnand %p623_p2, %p620_p1 }
 0x411   :  { %628 = shalt.err (!%p625_p3)
}
 0x412   :  { %418 = dma.vmem_to_hbm [thread:$0]  %s416_s21, 32, %s786_s7, [#allocation5]  }
 0x413   :  { %633 = dma.done.wait [#allocation5], 32  }
 0x414   :  { %634 = vsyncadd [#allocation5], 4294967264 }
 0x415   :  { %422 = vsyncpa [#allocation4], 1 }
 0x416   :  { %423 = vsyncpa [#allocation7], 1 }
 0x417   :  { %424 = vsyncpa [#allocation5], 1 }

</bundles_post_ra>
